<compile_context>
chip_gen: v7x
topology: tpu7x:2x2x1
jax: 0.10.0
libtpu: 0.0.40
codegen_flags: <defaults>
</compile_context>

<pallas_src>
import functools

import jax
import jax.numpy as jnp
from jax.experimental import pallas as pl
from jax.experimental.pallas import tpu as pltpu


# -----------------------------------------------------------------------------
# Kernel: fused 1x1 conv (matmul over channels) + bias + optional leaky ReLU
# -----------------------------------------------------------------------------
def _conv1x1_kernel(x_ref, w_ref, b_ref, o_ref, *, leaky_slope, nb):
    # x_ref: (Nb, Cin, T)   -- channels on sublanes, flat spatial on lanes
    # w_ref: (Cout, Cin)    -- VMEM-resident (constant index_map)
    # b_ref: (Cout, 1)      -- f32 bias
    # o_ref: (Nb, Cout, T)  -- lane-dense output
    w = w_ref[...]
    bias = b_ref[...]
    for i in range(nb):  # static unroll over the small batch sub-block
        y = jnp.dot(w, x_ref[i], preferred_element_type=jnp.float32) + bias
        if leaky_slope is not None:
            y = jnp.maximum(y, leaky_slope * y)   # leaky ReLU (slope in (0,1))
        o_ref[i] = y.astype(o_ref.dtype)


# -----------------------------------------------------------------------------
# Tiling heuristics
# -----------------------------------------------------------------------------
_MAX_BATCH_BLOCK = 16   # cap on images per block (keeps the kernel unroll small)


def _vmem_capacity_bytes():
    try:
        cap = int(pltpu.get_tpu_info().vmem_capacity_bytes)
        if cap > 0:
            return min(cap, 128 << 20)
    except Exception:
        pass
    return 64 << 20   # conservative fallback: v7x per-TensorCore VMEM


def _choose_tiles(N, Cin, Cout, HW, itemsize, vmem_budget, target_block_bytes):
    """Pick (Nb, T): batch sub-block and spatial (flat-pixel) tile."""
    per_lane_io = (Cin + Cout) * itemsize                       # in+out bytes / pixel
    cap_lanes = max(int(vmem_budget // (2 * per_lane_io)), 128)  # double-buffered
    tgt_lanes = max(int(target_block_bytes // per_lane_io), 128)
    lanes = min(cap_lanes, tgt_lanes)

    if HW > lanes:
        nb = 1
        t = (lanes // 128) * 128          # multiple of 128; ragged last tile via cdiv
    else:
        t = HW                             # full spatial extent (any HW: full-dim block)
        nb = max(1, min(N, lanes // max(HW, 1), _MAX_BATCH_BLOCK))

    # Keep >= 2 grid steps when there is enough data: feeds both v7x TensorCores
    # and keeps the DMA pipeline overlapped.  Never split tiny problems.
    total_io_bytes = N * HW * per_lane_io
    if pl.cdiv(N, nb) * pl.cdiv(HW, t) < 2 and total_io_bytes >= (4 << 20):
        if N >= 2:
            nb = max(1, (nb + 1) // 2)
        elif HW >= 256:
            t = (((HW + 1) // 2 + 127) // 128) * 128
    return nb, t


# -----------------------------------------------------------------------------
# Wrapper
# -----------------------------------------------------------------------------
def conv1x1_deploy(x, w, b=None, *, stride=1, relu=False,
                   target_block_bytes=8 << 20, vmem_budget_bytes=None):
    """Forward of Conv1X1_deploy: nn.Conv2d(c_in, c_out, 1, stride=s) [+ leaky_relu(0.05)].

    x: (N, Cin, H, W)   (NCHW, PyTorch layout), f32 or bf16
    w: (Cout, Cin, 1, 1) or (Cout, Cin)
    b: (Cout,) or None
    """
    N, Cin, H, W = x.shape
    if stride > 1:
        # TODO(synk): fold stride into the kernel (row-select index_map + lane-strided
        # read); this XLA strided slice materializes an extra HBM copy.
        x = x[:, :, ::stride, ::stride]
        H, W = x.shape[2], x.shape[3]

    Cout = w.shape[0]
    w2 = w.reshape(Cout, Cin).astype(x.dtype)
    if b is None:
        b2 = jnp.zeros((Cout, 1), jnp.float32)
    else:
        b2 = b.reshape(Cout, 1).astype(jnp.float32)

    HW = H * W
    itemsize = jnp.dtype(x.dtype).itemsize
    if vmem_budget_bytes is None:
        cap = _vmem_capacity_bytes()
        vmem_budget_bytes = max(cap // 2 - (8 << 20), 16 << 20)
    nb, tile = _choose_tiles(N, Cin, Cout, HW, itemsize,
                             vmem_budget_bytes, target_block_bytes)

    xf = x.reshape(N, Cin, HW)   # NCHW-flat view: contiguous, no transpose / copy

    # Double-buffered in+out blocks + weights/bias, with headroom.
    vmem_needed = (2 * nb * (Cin + Cout) * tile * itemsize
                   + 2 * (Cout * Cin * itemsize + Cout * 4))
    vmem_limit = int(max(vmem_needed + max(vmem_needed // 4, 4 << 20), 32 << 20))

    kern = functools.partial(_conv1x1_kernel,
                             leaky_slope=0.05 if relu else None, nb=nb)
    out = pl.pallas_call(
        kern,
        out_shape=jax.ShapeDtypeStruct((N, Cout, HW), x.dtype),
        grid_spec=pltpu.PrefetchScalarGridSpec(
            num_scalar_prefetch=0,
            grid=(pl.cdiv(N, nb), pl.cdiv(HW, tile)),   # ragged blocks are masked
            in_specs=[
                pl.BlockSpec((nb, Cin, tile), lambda n, t: (n, 0, t)),
                pl.BlockSpec((Cout, Cin), lambda n, t: (0, 0)),   # weights stay VMEM-resident
                pl.BlockSpec((Cout, 1), lambda n, t: (0, 0)),
            ],
            out_specs=pl.BlockSpec((nb, Cout, tile), lambda n, t: (n, 0, t)),
        ),
        compiler_params=pltpu.CompilerParams(
            dimension_semantics=("parallel", "parallel"),
            vmem_limit_bytes=vmem_limit),
    )(xf, w2, b2)

    return out.reshape(N, Cout, H, W)


# -----------------------------------------------------------------------------
# Smoke tests
# -----------------------------------------------------------------------------
if __name__ == "__main__":
    key = jax.random.PRNGKey(0)
    kx, kw, kb = jax.random.split(key, 3)

    def torch_ref(x, w, b, stride=1, relu=False):
        xs = x[:, :, ::stride, ::stride] if stride > 1 else x
        co, ci = w.shape[0], w.shape[1]
        y = jnp.einsum('oc,nchw->nohw', w.reshape(co, ci).astype(jnp.float32),
                       xs.astype(jnp.float32))
        y = y + b.reshape(1, co, 1, 1).astype(jnp.float32)
        if relu:
            y = jnp.where(y >= 0, y, 0.05 * y)
        return y

    # --- required small shape: batch=2, channels 4->8, spatial 16x16 ---
    N, Cin, Cout, H, W = 2, 4, 8, 16, 16
    x = jax.random.normal(kx, (N, Cin, H, W), jnp.float32)
    bound = 1.0 / (Cin ** 0.5)
    w = jax.random.uniform(kw, (Cout, Cin, 1, 1), jnp.float32, -bound, bound)
    b = jax.random.uniform(kb, (Cout,), jnp.float32, -bound, bound)

    fwd = jax.jit(functools.partial(conv1x1_deploy, stride=1, relu=False))
    out = jax.block_until_ready(fwd(x, w, b))
    ref = torch_ref(x, w, b)
    assert out.shape == (N, Cout, H, W), (out.shape, (N, Cout, H, W))
    assert bool(jnp.allclose(out, ref, atol=1e-5, rtol=1e-5))
    assert bool(jnp.all(jnp.isfinite(out)))

    # leaky-ReLU path (negative_slope=0.05), fused in-kernel
    fwd_r = jax.jit(functools.partial(conv1x1_deploy, stride=1, relu=True))
    out_r = jax.block_until_ready(fwd_r(x, w, b))
    assert bool(jnp.allclose(out_r, torch_ref(x, w, b, relu=True), atol=1e-5, rtol=1e-5))

    # stride=2 path
    fwd_s = jax.jit(functools.partial(conv1x1_deploy, stride=2, relu=False))
    out_s = jax.block_until_ready(fwd_s(x, w, b))
    assert out_s.shape == (N, Cout, H // 2, W // 2)
    assert bool(jnp.allclose(out_s, torch_ref(x, w, b, stride=2), atol=1e-5, rtol=1e-5))

    # batch-blocked path: several images packed into one block
    N2, H2 = 4, 64
    x2 = jax.random.normal(jax.random.PRNGKey(1), (N2, Cin, H2, H2), jnp.float32)
    out2 = jax.block_until_ready(
        jax.jit(functools.partial(conv1x1_deploy, relu=True))(x2, w, b))
    assert bool(jnp.allclose(out2, torch_ref(x2, w, b, relu=True), atol=1e-4, rtol=1e-4))

    # ragged spatial tiling (HW=400 with 128-lane tiles) + odd channel counts
    N3, Ci3, Co3, H3, W3 = 3, 5, 7, 10, 40
    x3 = jax.random.normal(jax.random.PRNGKey(2), (N3, Ci3, H3, W3), jnp.float32)
    w3 = jax.random.uniform(jax.random.PRNGKey(3), (Co3, Ci3, 1, 1), jnp.float32, -0.5, 0.5)
    b3 = jax.random.uniform(jax.random.PRNGKey(4), (Co3,), jnp.float32, -0.5, 0.5)
    out3 = jax.block_until_ready(
        jax.jit(functools.partial(conv1x1_deploy,
                                  target_block_bytes=128 * (Ci3 + Co3) * 4))(x3, w3, b3))
    assert bool(jnp.allclose(out3, torch_ref(x3, w3, b3), atol=1e-5, rtol=1e-5))

    # ragged batch blocking (Nb=2 does not divide N=3)
    out4 = jax.block_until_ready(
        jax.jit(functools.partial(conv1x1_deploy,
                                  target_block_bytes=800 * (Ci3 + Co3) * 4))(x3, w3, b3))
    assert bool(jnp.allclose(out4, torch_ref(x3, w3, b3), atol=1e-5, rtol=1e-5))

    # bf16 I/O (halves HBM traffic); accumulation stays f32 in-kernel
    out_bf = jax.block_until_ready(
        jax.jit(functools.partial(conv1x1_deploy, relu=True))(
            x.astype(jnp.bfloat16), w.astype(jnp.bfloat16), b))
    ref_bf = torch_ref(x.astype(jnp.bfloat16).astype(jnp.float32),
                       w.astype(jnp.bfloat16).astype(jnp.float32), b, relu=True)
    assert out_bf.dtype == jnp.bfloat16
    assert bool(jnp.allclose(out_bf.astype(jnp.float32), ref_bf, atol=5e-2, rtol=5e-2))

    print("KERNEL_OK")
</pallas_src>

<mosaic_0001>
module attributes {stable_mosaic.version = 11 : i64} {
  func.func @_conv1x1_kernel(%arg0: i32, %arg1: i32, %arg2: memref<2x4x256xf32, #tpu.memory_space<vmem>>, %arg3: memref<8x4xf32, #tpu.memory_space<vmem>>, %arg4: memref<8x1xf32, #tpu.memory_space<vmem>>, %arg5: memref<2x8x256xf32, #tpu.memory_space<vmem>>) attributes {dimension_semantics = [#tpu.dimension_semantics<parallel>, #tpu.dimension_semantics<parallel>], iteration_bounds = array<i64: 1, 1>, scalar_prefetch = 0 : i64, scratch_operands = 0 : i64, tpu.core_type = #tpu.core_type<tc>, window_params = [{transform_indices = @transform_0, window_bounds = array<i64: 2, 4, 256>}, {pipeline_mode = #tpu.pipeline_mode<synchronous>, transform_indices = @transform_1, window_bounds = array<i64: 8, 4>}, {pipeline_mode = #tpu.pipeline_mode<synchronous>, transform_indices = @transform_2, window_bounds = array<i64: 8, 1>}, {transform_indices = @transform_3, window_bounds = array<i64: 2, 8, 256>}]} {
    %c0 = arith.constant 0 : index
    %c0_0 = arith.constant 0 : index
    %0 = vector.load %arg3[%c0, %c0_0] : memref<8x4xf32, #tpu.memory_space<vmem>>, vector<8x4xf32>
    %c0_1 = arith.constant 0 : index
    %c0_2 = arith.constant 0 : index
    %1 = vector.load %arg4[%c0_1, %c0_2] : memref<8x1xf32, #tpu.memory_space<vmem>>, vector<8x1xf32>
    %c0_3 = arith.constant 0 : index
    %c0_4 = arith.constant 0 : index
    %c0_5 = arith.constant 0 : index
    %2 = vector.load %arg2[%c0_3, %c0_4, %c0_5] : memref<2x4x256xf32, #tpu.memory_space<vmem>>, vector<1x4x256xf32>
    %3 = vector.shape_cast %2 : vector<1x4x256xf32> to vector<4x256xf32>
    %cst = arith.constant dense<0.000000e+00> : vector<8x256xf32>
    %4 = tpu.matmul %0, %3, %cst {dimension_numbers = #tpu.dot_dimension_numbers<[1], [0], [0], [1], [0, 0, 1, 1], [], []>} : vector<8x4xf32>, vector<4x256xf32>, vector<8x256xf32> -> vector<8x256xf32>
    %5 = vector.broadcast %1 : vector<8x1xf32> to vector<8x256xf32>
    %6 = arith.addf %4, %5 : vector<8x256xf32>
    %c0_6 = arith.constant 0 : index
    %c0_7 = arith.constant 0 : index
    %c0_8 = arith.constant 0 : index
    %7 = vector.load %arg5[%c0_6, %c0_7, %c0_8] : memref<2x8x256xf32, #tpu.memory_space<vmem>>, vector<1x8x256xf32>
    %8 = vector.shape_cast %7 : vector<1x8x256xf32> to vector<8x256xf32>
    %9 = vector.shape_cast %6 : vector<8x256xf32> to vector<1x8x256xf32>
    tpu.vector_store %arg5[%c0_6, %c0_7, %c0_8], %9 {strides = array<i32>} : memref<2x8x256xf32, #tpu.memory_space<vmem>>, vector<1x8x256xf32>,
    %c1 = arith.constant 1 : index
    %c0_9 = arith.constant 0 : index
    %c0_10 = arith.constant 0 : index
    %10 = vector.load %arg2[%c1, %c0_9, %c0_10] : memref<2x4x256xf32, #tpu.memory_space<vmem>>, vector<1x4x256xf32>
    %11 = vector.shape_cast %10 : vector<1x4x256xf32> to vector<4x256xf32>
    %cst_11 = arith.constant dense<0.000000e+00> : vector<8x256xf32>
    %12 = tpu.matmul %0, %11, %cst_11 {dimension_numbers = #tpu.dot_dimension_numbers<[1], [0], [0], [1], [0, 0, 1, 1], [], []>} : vector<8x4xf32>, vector<4x256xf32>, vector<8x256xf32> -> vector<8x256xf32>
    %13 = vector.broadcast %1 : vector<8x1xf32> to vector<8x256xf32>
    %14 = arith.addf %12, %13 : vector<8x256xf32>
    %c1_12 = arith.constant 1 : index
    %c0_13 = arith.constant 0 : index
    %c0_14 = arith.constant 0 : index
    %15 = vector.load %arg5[%c1_12, %c0_13, %c0_14] : memref<2x8x256xf32, #tpu.memory_space<vmem>>, vector<1x8x256xf32>
    %16 = vector.shape_cast %15 : vector<1x8x256xf32> to vector<8x256xf32>
    %17 = vector.shape_cast %14 : vector<8x256xf32> to vector<1x8x256xf32>
    tpu.vector_store %arg5[%c1_12, %c0_13, %c0_14], %17 {strides = array<i32>} : memref<2x8x256xf32, #tpu.memory_space<vmem>>, vector<1x8x256xf32>,
    return
  }
  func.func @transform_0(%arg0: i32, %arg1: i32) -> (i32, i32, i32) {
    %c0_i32 = arith.constant 0 : i32
    %c0_i32_0 = arith.constant 0 : i32
    return %arg0, %c0_i32, %arg1 : i32, i32, i32
  }
  func.func @transform_1(%arg0: i32, %arg1: i32) -> (i32, i32) {
    %c0_i32 = arith.constant 0 : i32
    %c0_i32_0 = arith.constant 0 : i32
    %c0_i32_1 = arith.constant 0 : i32
    return %c0_i32, %c0_i32_0 : i32, i32
  }
  func.func @transform_2(%arg0: i32, %arg1: i32) -> (i32, i32) {
    %c0_i32 = arith.constant 0 : i32
    %c0_i32_0 = arith.constant 0 : i32
    %c0_i32_1 = arith.constant 0 : i32
    return %c0_i32, %c0_i32_0 : i32, i32
  }
  func.func @transform_3(%arg0: i32, %arg1: i32) -> (i32, i32, i32) {
    %c0_i32 = arith.constant 0 : i32
    %c0_i32_0 = arith.constant 0 : i32
    return %arg0, %c0_i32, %arg1 : i32, i32, i32
  }
}

</mosaic_0001>

<bundles_post_ra>
// kernel: conv1x1_deploy.1
= control target key start
LH: loop header
LB: loop body
LE: loop exit
PB: predicated region body
PF: predicated region fallthrough
CT: control target
= control target key end

     0   :  { %vm28_vm0 = vcmask 1043456   ;;  %v206_v2 = vmov 0.0   ;;  %v207_v5 = vmov 0   ;;  %vm24_vm1 = vcmask 31744   ;;  %s256_s0 = inlined_call_operand.vmem [shape: f32[2,4,256], index: 0, kind: input, shape index: {}]   ;;  %s257_s1 = inlined_call_operand.vmem [shape: f32[8,4], index: 1, kind: input, shape index: {}]   ;;  %s258_s2 = inlined_call_operand.vmem [shape: f32[8,1], index: 2, kind: input, shape index: {}]   ;;  %s259_s3 = inlined_call_operand.vmem [shape: f32[2,8,256], index: 3, kind: output, shape index: {}]  }
   0x1   :  { %v16_v0 = vld [vmem:[%s256_s0] sm:$0xff]  ;;  %v195_v1 = vld [vmem:[%s256_s0 + $0x8] sm:$0xff]  ;;  %97 = vmatprep.mubr.f32.mxu0 %v206_v2  ;;  %178 = vmatprep.mubr.f32.mxu1 %v206_v2 }
   0x2   :  { %v23_v3 = vcombine.high %v16_v0, %v16_v0  ;;  %v109_v4 = vcombine.high %v195_v1, %v195_v1  ;;  %203 = vset.pattern.permute.xlu0 %v207_v5  ;;  %v15_v6 = vld [vmem:[%s258_s2] sm:$0xff] }
   0x3   :  { %v14_v7 = vld [vmem:[%s257_s1] sm:$0xff]  ;;  %19 = vperm.xlu0 %203, %v15_v6  }
   0x4   :  { %192 = vmatprep.subr.msk.mxu0 %vm28_vm0, %v23_v3  ;;  %196 = vmatprep.subr.msk.mxu1 %vm28_vm0, %v109_v4 }
   0x5   :  { %193 = vmatpush1.msk.msra.mxu0 %vm28_vm0, %v16_v0  ;;  %197 = vmatpush1.msk.msra.mxu1 %vm28_vm0, %v195_v1 }
   0x6   :  { %194 = vmatmul.mubr.msk.f32.vlgmr.msra.gmra.mrb[0].mxu0 %vm24_vm1, %v14_v7  ;;  %198 = vmatmul.mubr.msk.f32.vlgmr.msra.gmra.mrb[0].mxu1 %vm24_vm1, %v14_v7 }
  0x82   :  { %v20_v8 = vpop.permute.xlu0 %19 }
  0xd9   :  { %v99_v9 = vpop.f32.mrb[0].mxu0  ;;  %v180_v10 = vpop.f32.mrb[0].mxu1 }
  0xda   :  { %v100_v11 = vadd.f32 %v99_v9, %v20_v8  ;;  %v181_v12 = vadd.f32 %v180_v10, %v20_v8  ;;  %v101_v13 = vpop.f32.mrb[1].mxu0  ;;  %v182_v14 = vpop.f32.mrb[1].mxu1 }
  0xdb   :  { %v102_v15 = vadd.f32 %v101_v13, %v20_v8  ;;  %v183_v16 = vadd.f32 %v182_v14, %v20_v8 }
  0xdc   :  { %104 = vst [vmem:[%s259_s3] sm:$0xff] %v100_v11  ;;  %199 = vst [vmem:[%s259_s3 + $0x10] sm:$0xff] %v181_v12 }
  0xdd   :  { %105 = vst [vmem:[%s259_s3 + $0x8] sm:$0xff] %v102_v15  ;;  %200 = vst [vmem:[%s259_s3 + $0x18] sm:$0xff] %v183_v16 }

</bundles_post_ra>
